<compile_context>
chip_gen: v5e
topology: v5e:2x2
jax: 0.10.0
libtpu: 0.0.40
codegen_flags: <defaults>
</compile_context>

<pallas_src>
import jax
import jax.numpy as jnp
from jax.experimental import pallas as pl
from jax.experimental.pallas import tpu as pltpu


def _round_up(x, m):
    return (x + m - 1) // m * m


def _vmem_capacity_bytes():
    try:
        return int(pltpu.get_tpu_info().vmem_capacity_bytes)
    except Exception:
        return 64 * 1024 * 1024  # conservative (v7x-sized) default


def _buffered_spec(shape, index_map, nbuf):
    """BlockSpec with an explicit buffer count; falls back gracefully."""
    if hasattr(pl, "Buffered"):
        try:
            return pl.BlockSpec(shape, index_map, pipeline_mode=pl.Buffered(nbuf))
        except TypeError:
            pass
    return pl.BlockSpec(shape, index_map)


# ----------------------------------------------------------------------------
# Kernel
# ----------------------------------------------------------------------------
def _image_adapter_kernel(x_ref, w1_ref, b1_ref, w2_ref, b2_ref, o_ref, acc_ref):
    # Grid: (M tiles, KO tiles) where KO tiles the shared intermediate dim
    # (linear1's output features == linear2's reduction dim).
    #   x_ref : (TM, F_in_p)      native dtype, cast to bf16 here
    #   w1_ref: (F_in_p, TKO)     bf16   (torch W1.T column block)
    #   b1_ref: (1, TKO)          f32
    #   w2_ref: (TKO, F_out_p)    bf16   (torch W2.T row block)
    #   b2_ref: (1, F_out_p)      f32
    #   o_ref : (TM, F_out_p)
    #   acc_ref: (TM, F_out_p)    f32 scratch accumulator
    ko = pl.program_id(1)

    @pl.when(ko == 0)
    def _():
        acc_ref[...] = jnp.zeros_like(acc_ref)

    x = x_ref[...].astype(jnp.bfloat16)

    # linear1 column-block on the MXU, f32 accumulation.
    h = jnp.dot(x, w1_ref[...], preferred_element_type=jnp.float32)
    h = h + b1_ref[...]

    # tanh-approx GELU: exp/tanh route to the EUP slot (otherwise idle) instead
    # of the ~25-op erf VPU polynomial that saturates the VALU on v6e/v7x.
    h = jax.nn.gelu(h, approximate=True)

    # linear2 partial product for this KO block, accumulated in f32.
    acc_ref[...] += jnp.dot(h.astype(jnp.bfloat16), w2_ref[...],
                            preferred_element_type=jnp.float32)

    @pl.when(ko == pl.num_programs(1) - 1)
    def _():
        o_ref[...] = (acc_ref[...] + b2_ref[...]).astype(o_ref.dtype)


# ----------------------------------------------------------------------------
# Tiling / VMEM plan
# ----------------------------------------------------------------------------
def _plan(M, F_in_p, F_out_p, x_bytes, out_bytes):
    """Pick (TM, TKO, vmem_limit_bytes) for this generation's VMEM."""
    vmem_cap = _vmem_capacity_bytes()
    budget = int(vmem_cap * 0.75)      # headroom for compiler-internal scratch
    limit_cap = int(vmem_cap * 0.90)   # never request all of physical VMEM

    m8 = _round_up(M, 8)
    tm_cands = [t for t in (1024, 512, 256, 128, 64, 32, 16, 8) if t <= m8] or [m8]
    # Resident weights first; otherwise tile the intermediate dim (divisors only).
    tko_cands = [F_out_p] + [t for t in (2048, 1024, 512, 256, 128)
                             if t < F_out_p and F_out_p % t == 0]

    def estimate(tm, tko, resident):
        wbuf = 1 if resident else 2                       # Buffered(1) when resident
        w = wbuf * 2 * (F_in_p * tko + tko * F_out_p)     # bf16 weight blocks
        b = wbuf * 4 * tko + 4 * F_out_p                  # f32 biases
        xb = 2 * tm * F_in_p * x_bytes                    # double-buffered x tile
        ob = 2 * tm * F_out_p * out_bytes                 # double-buffered out tile
        acc = tm * F_out_p * 4                            # f32 accumulator scratch
        inter = tm * tko * (4 + 2) + tm * F_out_p * 4     # h f32 + h bf16 + partial y
        return w + b + xb + ob + acc + inter

    for tko in tko_cands:
        resident = tko == F_out_p
        for tm in tm_cands:
            tot = estimate(tm, tko, resident)
            if tot <= budget:
                # Keep >= ~4 parallel M tiles so both v7x TensorCores get work.
                while tm >= 256 and pl.cdiv(M, tm) < 4:
                    tm //= 2
                    tot = estimate(tm, tko, resident)
                vmem = min(max(int(tot * 1.3), 16 * 1024 * 1024), limit_cap)
                return tm, tko, vmem

    # Last resort: smallest tiles, capped VMEM request (still pipelined).
    tm = tm_cands[-1]
    if F_out_p > 256 and F_out_p % 256 == 0:
        tko = 256
    elif F_out_p > 128:
        tko = 128
    else:
        tko = F_out_p
    return tm, tko, limit_cap


# ----------------------------------------------------------------------------
# Parameter prep (one-time pad + cast, hoisted out of the forward pass)
# ----------------------------------------------------------------------------
def prepare_image_adapter_params(w1, b1, w2, b2):
    """Pad feature dims to multiples of 128 and cast once.

    Weights are in (in, out) layout (i.e. torch nn.Linear weight transposed).
    """
    F_in, F_out = w1.shape
    F_in_p = _round_up(F_in, 128)
    F_out_p = _round_up(F_out, 128)

    def pad2(a, r, c):
        pr, pc = r - a.shape[0], c - a.shape[1]
        return a if (pr == 0 and pc == 0) else jnp.pad(a, ((0, pr), (0, pc)))

    return dict(
        w1=pad2(w1, F_in_p, F_out_p).astype(jnp.bfloat16),
        w2=pad2(w2, F_out_p, F_out_p).astype(jnp.bfloat16),
        b1=pad2(b1.astype(jnp.float32).reshape(1, -1), 1, F_out_p),
        b2=pad2(b2.astype(jnp.float32).reshape(1, -1), 1, F_out_p),
        F_in=F_in, F_out=F_out, F_in_p=F_in_p, F_out_p=F_out_p,
    )


# ----------------------------------------------------------------------------
# Forward
# ----------------------------------------------------------------------------
def image_adapter_forward(vision_outputs, params, out_dtype=None):
    """vision_outputs: (B, S, F_in) -> (B, S, F_out)."""
    B, S, F_in = vision_outputs.shape
    assert F_in == params["F_in"]
    F_out, F_in_p, F_out_p = params["F_out"], params["F_in_p"], params["F_out_p"]

    M = B * S
    out_dtype = vision_outputs.dtype if out_dtype is None else out_dtype
    x_bytes = jnp.dtype(vision_outputs.dtype).itemsize
    out_bytes = jnp.dtype(out_dtype).itemsize

    tm, tko, vmem_bytes = _plan(M, F_in_p, F_out_p, x_bytes, out_bytes)
    M_pad = _round_up(M, tm)
    n_m = M_pad // tm
    n_ko = F_out_p // tko
    resident = n_ko == 1

    # x stays in its native dtype (bf16 cast happens per-tile in the kernel);
    # pad only when the shapes actually need it.
    x2d = vision_outputs.reshape(M, F_in)
    if M_pad != M or F_in_p != F_in:
        x2d = jnp.pad(x2d, ((0, M_pad - M), (0, F_in_p - F_in)))

    if resident:
        # Constant index_maps -> single-buffered, DMA'd exactly once.
        w1_spec = _buffered_spec((F_in_p, F_out_p), lambda i, k: (0, 0), 1)
        b1_spec = _buffered_spec((1, F_out_p), lambda i, k: (0, 0), 1)
        w2_spec = _buffered_spec((F_out_p, F_out_p), lambda i, k: (0, 0), 1)
    else:
        # Weight blocks streamed over the KO axis (default double-buffering).
        w1_spec = pl.BlockSpec((F_in_p, tko), lambda i, k: (0, k))
        b1_spec = pl.BlockSpec((1, tko), lambda i, k: (0, k))
        w2_spec = pl.BlockSpec((tko, F_out_p), lambda i, k: (k, 0))
    b2_spec = _buffered_spec((1, F_out_p), lambda i, k: (0, 0), 1)

    out2d = pl.pallas_call(
        _image_adapter_kernel,
        out_shape=jax.ShapeDtypeStruct((M_pad, F_out_p), out_dtype),
        grid_spec=pltpu.PrefetchScalarGridSpec(
            num_scalar_prefetch=0,
            grid=(n_m, n_ko),
            in_specs=[
                pl.BlockSpec((tm, F_in_p), lambda i, k: (i, 0)),   # streamed x
                w1_spec,
                b1_spec,
                w2_spec,
                b2_spec,
            ],
            out_specs=pl.BlockSpec((tm, F_out_p), lambda i, k: (i, 0)),
            scratch_shapes=[pltpu.VMEM((tm, F_out_p), jnp.float32)],
        ),
        compiler_params=pltpu.CompilerParams(
            # Independent M tiles shard across v7x's two TensorCores; the KO
            # axis is a reduction (accumulator) and must stay "arbitrary".
            dimension_semantics=("parallel", "arbitrary"),
            vmem_limit_bytes=vmem_bytes,
        ),
    )(x2d, params["w1"], params["b1"], params["w2"], params["b2"])

    return out2d[:M, :F_out].reshape(B, S, F_out)


# ----------------------------------------------------------------------------
# Synthetic init (nn.Linear-style), kernel-friendly (in, out) layout
# ----------------------------------------------------------------------------
def _init_params(key, input_features, output_features, dtype=jnp.float32):
    k1, k2, k3, k4 = jax.random.split(key, 4)
    s1 = 1.0 / jnp.sqrt(input_features)
    s2 = 1.0 / jnp.sqrt(output_features)
    w1 = jax.random.uniform(k1, (input_features, output_features), dtype, -s1, s1)
    b1 = jax.random.uniform(k2, (output_features,), dtype, -s1, s1)
    w2 = jax.random.uniform(k3, (output_features, output_features), dtype, -s2, s2)
    b2 = jax.random.uniform(k4, (output_features,), dtype, -s2, s2)
    return w1, b1, w2, b2


if __name__ == "__main__":
    B, S = 2, 8
    input_features, output_features = 32, 32

    key = jax.random.PRNGKey(0)
    k_x, k_p = jax.random.split(key)

    vision_outputs = jax.random.normal(k_x, (B, S, input_features),
                                       dtype=jnp.float32)
    w1, b1, w2, b2 = _init_params(k_p, input_features, output_features)

    params = prepare_image_adapter_params(w1, b1, w2, b2)
    out = image_adapter_forward(vision_outputs, params)
    out = jax.block_until_ready(out)

    # Pure-JAX reference with the same numerics as the kernel path
    # (bf16 matmul inputs, f32 accumulation, tanh-approx GELU).
    x2d = vision_outputs.reshape(-1, input_features).astype(jnp.bfloat16)
    h = jnp.dot(x2d, w1.astype(jnp.bfloat16),
                preferred_element_type=jnp.float32) + b1
    h = jax.nn.gelu(h, approximate=True)
    ref = jnp.dot(h.astype(jnp.bfloat16), w2.astype(jnp.bfloat16),
                  preferred_element_type=jnp.float32) + b2
    ref = ref.reshape(B, S, output_features).astype(vision_outputs.dtype)

    assert out.shape == (B, S, output_features)
    assert jnp.allclose(out, ref, atol=2e-2, rtol=2e-2), \
        float(jnp.max(jnp.abs(out - ref)))

    print("KERNEL_OK")
</pallas_src>

<mosaic_0001>
module attributes {stable_mosaic.version = 11 : i64} {
  func.func @_image_adapter_kernel(%arg0: i32, %arg1: i32, %arg2: memref<16x128xf32, #tpu.memory_space<vmem>>, %arg3: memref<128x128xbf16, #tpu.memory_space<vmem>>, %arg4: memref<1x128xf32, #tpu.memory_space<vmem>>, %arg5: memref<128x128xbf16, #tpu.memory_space<vmem>>, %arg6: memref<1x128xf32, #tpu.memory_space<vmem>>, %arg7: memref<16x128xf32, #tpu.memory_space<vmem>>, %arg8: memref<16x128xf32, #tpu.memory_space<vmem>>) attributes {dimension_semantics = [#tpu.dimension_semantics<parallel>, #tpu.dimension_semantics<arbitrary>], iteration_bounds = array<i64: 1, 1>, scalar_prefetch = 0 : i64, scratch_operands = 1 : i64, tpu.core_type = #tpu.core_type<tc>, window_params = [{transform_indices = @transform_0, window_bounds = array<i64: 16, 128>}, {pipeline_mode = #tpu.pipeline_mode<synchronous>, transform_indices = @transform_1, window_bounds = array<i64: 128, 128>}, {pipeline_mode = #tpu.pipeline_mode<synchronous>, transform_indices = @transform_2, window_bounds = array<i64: 1, 128>}, {pipeline_mode = #tpu.pipeline_mode<synchronous>, transform_indices = @transform_3, window_bounds = array<i64: 128, 128>}, {pipeline_mode = #tpu.pipeline_mode<synchronous>, transform_indices = @transform_4, window_bounds = array<i64: 1, 128>}, {transform_indices = @transform_5, window_bounds = array<i64: 16, 128>}]} {
    %c0_i32 = arith.constant 0 : i32
    %0 = arith.cmpi eq, %arg1, %c0_i32 : i32
    %1 = arith.extui %0 : i1 to i32
    %c0_i32_0 = arith.constant 0 : i32
    %2 = arith.cmpi ne, %1, %c0_i32_0 : i32
    scf.if %2 {
      %cst_19 = arith.constant 0.000000e+00 : f32
      %32 = vector.broadcast %cst_19 : f32 to vector<16x128xf32>
      %c0_20 = arith.constant 0 : index
      %c0_21 = arith.constant 0 : index
      %33 = vector.load %arg8[%c0_20, %c0_21] : memref<16x128xf32, #tpu.memory_space<vmem>>, vector<16x128xf32>
      tpu.vector_store %arg8[%c0_20, %c0_21], %32 {strides = array<i32>} : memref<16x128xf32, #tpu.memory_space<vmem>>, vector<16x128xf32>,
    } else {
    }
    %c0 = arith.constant 0 : index
    %c0_1 = arith.constant 0 : index
    %3 = vector.load %arg2[%c0, %c0_1] : memref<16x128xf32, #tpu.memory_space<vmem>>, vector<16x128xf32>
    %4 = arith.truncf %3 : vector<16x128xf32> to vector<16x128xbf16>
    %c0_2 = arith.constant 0 : index
    %c0_3 = arith.constant 0 : index
    %5 = vector.load %arg3[%c0_2, %c0_3] : memref<128x128xbf16, #tpu.memory_space<vmem>>, vector<128x128xbf16>
    %cst = arith.constant dense<0.000000e+00> : vector<16x128xf32>
    %6 = tpu.matmul %4, %5, %cst {dimension_numbers = #tpu.dot_dimension_numbers<[1], [0], [0], [1], [0, 0, 1, 1], [], []>} : vector<16x128xbf16>, vector<128x128xbf16>, vector<16x128xf32> -> vector<16x128xf32>
    %c0_4 = arith.constant 0 : index
    %c0_5 = arith.constant 0 : index
    %7 = vector.load %arg4[%c0_4, %c0_5] : memref<1x128xf32, #tpu.memory_space<vmem>>, vector<1x128xf32>
    %8 = vector.broadcast %7 : vector<1x128xf32> to vector<16x128xf32>
    %9 = arith.addf %6, %8 : vector<16x128xf32>
    %10 = arith.mulf %9, %9 : vector<16x128xf32>
    %11 = arith.mulf %9, %10 : vector<16x128xf32>
    %cst_6 = arith.constant 4.471500e-02 : f32
    %12 = vector.broadcast %cst_6 : f32 to vector<16x128xf32>
    %13 = arith.mulf %12, %11 : vector<16x128xf32>
    %14 = arith.addf %9, %13 : vector<16x128xf32>
    %cst_7 = arith.constant 0.797884583 : f32
    %15 = vector.broadcast %cst_7 : f32 to vector<16x128xf32>
    %16 = arith.mulf %15, %14 : vector<16x128xf32>
    %17 = math.tanh %16 : vector<16x128xf32>
    %cst_8 = arith.constant 1.000000e+00 : f32
    %18 = vector.broadcast %cst_8 : f32 to vector<16x128xf32>
    %19 = arith.addf %18, %17 : vector<16x128xf32>
    %cst_9 = arith.constant 5.000000e-01 : f32
    %20 = vector.broadcast %cst_9 : f32 to vector<16x128xf32>
    %21 = arith.mulf %20, %19 : vector<16x128xf32>
    %22 = arith.mulf %9, %21 : vector<16x128xf32>
    %c0_10 = arith.constant 0 : index
    %c0_11 = arith.constant 0 : index
    %23 = vector.load %arg8[%c0_10, %c0_11] : memref<16x128xf32, #tpu.memory_space<vmem>>, vector<16x128xf32>
    %24 = arith.truncf %22 : vector<16x128xf32> to vector<16x128xbf16>
    %c0_12 = arith.constant 0 : index
    %c0_13 = arith.constant 0 : index
    %25 = vector.load %arg5[%c0_12, %c0_13] : memref<128x128xbf16, #tpu.memory_space<vmem>>, vector<128x128xbf16>
    %cst_14 = arith.constant dense<0.000000e+00> : vector<16x128xf32>
    %26 = tpu.matmul %24, %25, %cst_14 {dimension_numbers = #tpu.dot_dimension_numbers<[1], [0], [0], [1], [0, 0, 1, 1], [], []>} : vector<16x128xbf16>, vector<128x128xbf16>, vector<16x128xf32> -> vector<16x128xf32>
    %27 = arith.addf %23, %26 : vector<16x128xf32>
    %c0_15 = arith.constant 0 : index
    %c0_16 = arith.constant 0 : index
    %28 = vector.load %arg8[%c0_15, %c0_16] : memref<16x128xf32, #tpu.memory_space<vmem>>, vector<16x128xf32>
    tpu.vector_store %arg8[%c0_15, %c0_16], %27 {strides = array<i32>} : memref<16x128xf32, #tpu.memory_space<vmem>>, vector<16x128xf32>,
    %c0_i32_17 = arith.constant 0 : i32
    %29 = arith.cmpi eq, %arg1, %c0_i32_17 : i32
    %30 = arith.extui %29 : i1 to i32
    %c0_i32_18 = arith.constant 0 : i32
    %31 = arith.cmpi ne, %30, %c0_i32_18 : i32
    scf.if %31 {
      %c0_19 = arith.constant 0 : index
      %c0_20 = arith.constant 0 : index
      %32 = vector.load %arg8[%c0_19, %c0_20] : memref<16x128xf32, #tpu.memory_space<vmem>>, vector<16x128xf32>
      %c0_21 = arith.constant 0 : index
      %c0_22 = arith.constant 0 : index
      %33 = vector.load %arg6[%c0_21, %c0_22] : memref<1x128xf32, #tpu.memory_space<vmem>>, vector<1x128xf32>
      %34 = vector.broadcast %33 : vector<1x128xf32> to vector<16x128xf32>
      %35 = arith.addf %32, %34 : vector<16x128xf32>
      %c0_23 = arith.constant 0 : index
      %c0_24 = arith.constant 0 : index
      %36 = vector.load %arg7[%c0_23, %c0_24] : memref<16x128xf32, #tpu.memory_space<vmem>>, vector<16x128xf32>
      tpu.vector_store %arg7[%c0_23, %c0_24], %35 {strides = array<i32>} : memref<16x128xf32, #tpu.memory_space<vmem>>, vector<16x128xf32>,
    } else {
    }
    return
  }
  func.func @transform_0(%arg0: i32, %arg1: i32) -> (i32, i32) {
    %c0_i32 = arith.constant 0 : i32
    %c0_i32_0 = arith.constant 0 : i32
    return %arg0, %c0_i32 : i32, i32
  }
  func.func @transform_1(%arg0: i32, %arg1: i32) -> (i32, i32) {
    %c0_i32 = arith.constant 0 : i32
    %c0_i32_0 = arith.constant 0 : i32
    %c0_i32_1 = arith.constant 0 : i32
    return %c0_i32, %c0_i32_0 : i32, i32
  }
  func.func @transform_2(%arg0: i32, %arg1: i32) -> (i32, i32) {
    %c0_i32 = arith.constant 0 : i32
    %c0_i32_0 = arith.constant 0 : i32
    %c0_i32_1 = arith.constant 0 : i32
    return %c0_i32, %c0_i32_0 : i32, i32
  }
  func.func @transform_3(%arg0: i32, %arg1: i32) -> (i32, i32) {
    %c0_i32 = arith.constant 0 : i32
    %c0_i32_0 = arith.constant 0 : i32
    %c0_i32_1 = arith.constant 0 : i32
    return %c0_i32, %c0_i32_0 : i32, i32
  }
  func.func @transform_4(%arg0: i32, %arg1: i32) -> (i32, i32) {
    %c0_i32 = arith.constant 0 : i32
    %c0_i32_0 = arith.constant 0 : i32
    %c0_i32_1 = arith.constant 0 : i32
    return %c0_i32, %c0_i32_0 : i32, i32
  }
  func.func @transform_5(%arg0: i32, %arg1: i32) -> (i32, i32) {
    %c0_i32 = arith.constant 0 : i32
    %c0_i32_0 = arith.constant 0 : i32
    return %arg0, %c0_i32 : i32, i32
  }
}

</mosaic_0001>

<bundles_post_ra>
// kernel: tpu_custom_call.1
= control target key start
LH: loop header
LB: loop body
LE: loop exit
PB: predicated region body
PF: predicated region fallthrough
CT: control target
= control target key end

     0   :  { %10 = vsyncpa [#allocation4], 0  ;;  %s553_s0 = inlined_call_operand.hbm [shape: f32[16,128], index: 0, kind: input, shape index: {}]   ;;  %s554_s1 = inlined_call_operand.hbm [shape: bf16[128,128], index: 1, kind: input, shape index: {}]   ;;  %s555_s2 = inlined_call_operand.vmem [shape: f32[1,128], index: 2, kind: input, shape index: {}]   ;;  %s556_s3 = inlined_call_operand.hbm [shape: bf16[128,128], index: 3, kind: input, shape index: {}]   ;;  %s557_s4 = inlined_call_operand.vmem [shape: f32[1,128], index: 4, kind: input, shape index: {}]   ;;  %s558_s5 = inlined_call_operand.hbm [shape: f32[16,128], index: 5, kind: output, shape index: {}]  }
   0x1   :  { %11 = vsyncpa [#allocation7], 0  ;;  %s30_s20 = sshll.u32 %s554_s1, 4  ;;  %s31_s20 = int_to_ptr.hbm [resolvable:$true] %s30_s20 }
   0x2   :  { %12 = vsyncpa [#allocation5], 0  ;;  %s491_s21 = smov [#allocation6]   ;;  %s17_s25 = sshll.u32 %s553_s0, 4  ;;  %s18_s25 = int_to_ptr.hbm [resolvable:$true] %s17_s25 }
   0x3   :  { %s32_s22 = sshll.u32 %s491_s21, 4  ;;  %s492_s26 = smov 64   ;;  %s33_s22 = int_to_ptr.vmem [resolvable:$true] %s32_s22 }
   0x4   :  { %s493_s27 = smov 4   ;;  %s494_s28 = smov [#allocation3]  }
   0x5   :  { %38 = dma.hbm_to_vmem [thread:$0]  %s31_s20, 1024, %s33_s22, [#allocation7], %s492_s26, %s492_s26, %s493_s27  }
   0x6   :  { %s19_s29 = sshll.u32 %s494_s28, 4  ;;  %s495_s30 = smov 128   ;;  %s20_s29 = int_to_ptr.vmem [resolvable:$true] %s19_s29 }
   0x7   :  { %s496_s6 = smov 8   ;;  %s45_s8 = sshll.u32 %s556_s3, 4  ;;  %s46_s8 = int_to_ptr.hbm [resolvable:$true] %s45_s8 }
   0x8   :  { %25 = dma.hbm_to_vmem [thread:$0]  %s18_s25, 256, %s20_s29, [#allocation4], %s495_s30, %s495_s30, %s496_s6  }
   0x9   :  { %s497_s9 = smov [#allocation8]  }
   0xa   :  { %s47_s0 = sshll.u32 %s497_s9, 4  ;;  %s48_s0 = int_to_ptr.vmem [resolvable:$true] %s47_s0 }
   0xb   :  { %53 = dma.hbm_to_vmem [thread:$0]  %s46_s8, 1024, %s48_s0, [#allocation7], %s492_s26, %s492_s26, %s493_s27  }
   0xc   :  { %485 = dma.done.wait [#allocation4], 256  }
   0xd   :  { %486 = vsyncadd [#allocation4], 4294967040 }
   0xe   :  { %487 = dma.done.wait [#allocation7], 2048  }
   0xf   :  { %488 = vsyncadd [#allocation7], 4294965248  ;;  %v366_v0 = vld [vmem:[#allocation6 + $0x38] sm:$0xff]  ;;  %v365_v1 = vld [vmem:[#allocation6 + $0x30] sm:$0xff]  ;;  %s498_s12 = smov [#allocation9]   ;;  %s281_s16 = sshll.u32 %s558_s5, 4  ;;  %s282_s16 = int_to_ptr.hbm [resolvable:$true] %s281_s16 }
  0x10   :  { %145 = vmatpush.bf16.msra.mxu0 %v366_v0  ;;  %v364_v2 = vld [vmem:[#allocation6 + $0x28] sm:$0xff]  ;;  %v363_v3 = vld [vmem:[#allocation6 + $0x20] sm:$0xff]  ;;  %v362_v4 = vld [vmem:[#allocation6 + $0x18] sm:$0xff]  ;;  %s279_s13 = sshll.u32 %s498_s12, 4  ;;  %s280_s13 = int_to_ptr.vmem [resolvable:$true] %s279_s13 }
  0x11   :  { %v361_v5 = vld [vmem:[#allocation6 + $0x10] sm:$0xff]  ;;  %v360_v6 = vld [vmem:[#allocation6 + $0x8] sm:$0xff]  ;;  %v359_v7 = vld [vmem:[#allocation6] sm:$0xff] }
  0x12   :  { %v74_v8 = vld [vmem:[#allocation3] sm:$0xff]  ;;  %v75_v9 = vld [vmem:[#allocation3 + $0x8] sm:$0xff]  ;;  %v372_v13 = vld [vmem:[#allocation8 + $0x28] sm:$0xff] }
  0x13   :  { %v76_v10 = vpack.c.bf16 %v75_v9, %v74_v8  ;;  %v374_v11 = vld [vmem:[#allocation8 + $0x38] sm:$0xff]  ;;  %v373_v12 = vld [vmem:[#allocation8 + $0x30] sm:$0xff]  ;;  %v371_v14 = vld [vmem:[#allocation8 + $0x20] sm:$0xff] }
  0x14   :  { %146 = vmatpush.bf16.msra.mxu0 %v365_v1  ;;  %244 = vmatpush.bf16.msra.mxu1 %v374_v11  ;;  %v370_v15 = vld [vmem:[#allocation8 + $0x18] sm:$0xff]  ;;  %v369_v16 = vld [vmem:[#allocation8 + $0x10] sm:$0xff]  ;;  %v368_v17 = vld [vmem:[#allocation8 + $0x8] sm:$0xff] }
  0x15   :  { %v383_v18 = vld [vmem:[%s555_s2] ss:$0 sm:$0xff]  ;;  %v367_v19 = vld [vmem:[#allocation8] sm:$0xff] }
  0x16   :  { %v384_v43 = vld [vmem:[%s557_s4] ss:$0 sm:$0xff] }
  0x18   :  { %147 = vmatpush.bf16.msra.mxu0 %v364_v2  ;;  %245 = vmatpush.bf16.msra.mxu1 %v373_v12 }
  0x1c   :  { %148 = vmatpush.bf16.msra.mxu0 %v363_v3  ;;  %246 = vmatpush.bf16.msra.mxu1 %v372_v13 }
  0x20   :  { %149 = vmatpush.bf16.msra.mxu0 %v362_v4  ;;  %247 = vmatpush.bf16.msra.mxu1 %v371_v14 }
  0x24   :  { %150 = vmatpush.bf16.msra.mxu0 %v361_v5  ;;  %248 = vmatpush.bf16.msra.mxu1 %v370_v15 }
  0x28   :  { %151 = vmatpush.bf16.msra.mxu0 %v360_v6  ;;  %249 = vmatpush.bf16.msra.mxu1 %v369_v16 }
  0x2c   :  { %152 = vmatpush.bf16.msra.mxu0 %v359_v7  ;;  %250 = vmatpush.bf16.msra.mxu1 %v368_v17 }
  0x2f   :  { %153 = vmatmul.bf16.vlgmr.msra.gmra.mxu0 %v76_v10 }
  0x30   :  { %251 = vmatpush.bf16.msra.mxu1 %v367_v19 }
  0xac   :  { %v154_v20 = vpop.f32.mrf.mxu0 }
  0xad   :  { %v155_v21 = vadd.f32 %v383_v18, %v154_v20 }
  0xaf   :  { %v159_v22 = vmul.f32 %v155_v21, %v155_v21 }
  0xb1   :  { %v161_v23 = vmul.f32 %v159_v22, %v155_v21 }
  0xb3   :  { %v163_v24 = vmul.f32 0.044715, %v161_v23 }
  0xb4   :  { %v156_v25 = vpop.f32.mrf.mxu0 }
  0xb5   :  { %v165_v26 = vadd.f32 %v163_v24, %v155_v21  ;;  %v157_v27 = vadd.f32 %v383_v18, %v156_v25 }
  0xb7   :  { %v160_v28 = vmul.f32 %v157_v27, %v157_v27  ;;  %v167_v29 = vmul.f32 0.7978846, %v165_v26 }
  0xb9   :  { %v162_v30 = vmul.f32 %v160_v28, %v157_v27  ;;  %385 = vtanh.f32 %v167_v29 }
  0xbb   :  { %v164_v31 = vmul.f32 0.044715, %v162_v30 }
  0xbd   :  { %v166_v32 = vadd.f32 %v164_v31, %v157_v27 }
  0xbf   :  { %v168_v33 = vmul.f32 0.7978846, %v166_v32  ;;  %v386_v34 = vpop.eup %385 }
  0xc0   :  { %v171_v35 = vadd.f32 1.0, %v386_v34 }
  0xc1   :  { %387 = vtanh.f32 %v168_v33 }
  0xc2   :  { %v173_v38 = vmul.f32 0.5, %v171_v35 }
  0xc4   :  { %v175_v40 = vmul.f32 %v173_v38, %v155_v21 }
  0xc7   :  { %v388_v36 = vpop.eup %387 }
  0xc8   :  { %v172_v37 = vadd.f32 1.0, %v388_v36 }
  0xca   :  { %v174_v39 = vmul.f32 0.5, %v172_v37 }
  0xcc   :  { %v176_v41 = vmul.f32 %v174_v39, %v157_v27 }
  0xce   :  { %v179_v42 = vpack.c.bf16 %v176_v41, %v175_v40 }
  0xd0   :  { %252 = vmatmul.bf16.vlgmr.msra.gmra.mxu1 %v179_v42 }
 0x14d   :  { %v253_v44 = vpop.f32.mrf.mxu1 }
 0x14e   :  { %v271_v45 = vadd.f32 %v384_v43, %v253_v44 }
 0x150   :  { %273 = vst [vmem:[#allocation9] sm:$0xff] %v271_v45 }
 0x155   :  { %v255_v46 = vpop.f32.mrf.mxu1 }
 0x156   :  { %v272_v47 = vadd.f32 %v384_v43, %v255_v46 }
 0x158   :  { %274 = vst [vmem:[#allocation9 + $0x8] sm:$0xff] %v272_v47 }
 0x159   :  { %287 = dma.vmem_to_hbm [thread:$0]  %s280_s13, 256, %s282_s16, [#allocation5], %s495_s30, %s495_s30, %s496_s6  }
 0x15a   :  { %489 = dma.done.wait [#allocation5], 256  }
 0x15b   :  { %490 = vsyncadd [#allocation5], 4294967040 }
 0x15c   :  { %292 = vsyncpa [#allocation4], 1 }
 0x15d   :  { %293 = vsyncpa [#allocation7], 1 }
 0x15e   :  { %294 = vsyncpa [#allocation5], 1 }

</bundles_post_ra>
